<compile_context>
chip_gen: v7x
topology: tpu7x:2x2x1
jax: 0.10.0
libtpu: 0.0.40
codegen_flags: <defaults>
</compile_context>

<pallas_src>
import jax
import jax.numpy as jnp
from jax.experimental import pallas as pl
from jax.experimental.pallas import tpu as pltpu


def _hbm_identity_kernel(x_ref, o_ref, sem):
    # out = embedding, as one streaming HBM->HBM DMA (no VMEM round-trip).
    copy = pltpu.make_async_copy(x_ref, o_ref, sem)
    copy.start()
    copy.wait()


def channel_vector_forward(embedding: jax.Array) -> jax.Array:
    """Forward pass of ChannelVector: returns the (1, 1, embed_dim) embedding."""
    assert embedding.ndim == 3 and embedding.shape[:2] == (1, 1)
    nbytes = embedding.size * embedding.dtype.itemsize

    return pl.pallas_call(
        _hbm_identity_kernel,
        out_shape=jax.ShapeDtypeStruct(embedding.shape, embedding.dtype),
        # Leave both operands in HBM; the kernel gets raw refs and DMAs once.
        in_specs=[pl.BlockSpec(memory_space=pl.ANY)],
        out_specs=pl.BlockSpec(memory_space=pl.ANY),
        scratch_shapes=[pltpu.SemaphoreType.DMA(())],
        # Purely memory-bound hint for XLA's scheduler: read E + write E bytes.
        cost_estimate=pl.CostEstimate(
            flops=0, transcendentals=0, bytes_accessed=2 * nbytes
        ),
    )(embedding)


class ChannelVector:
    """JAX/Pallas port of torchlake ChannelVector."""

    def __init__(self, embed_dim: int, key: jax.Array):
        # torch.rand(1, 1, embed_dim) -> uniform [0, 1)
        self.embedding = jax.random.uniform(
            key, (1, 1, embed_dim), dtype=jnp.float32
        )

    def __call__(self) -> jax.Array:
        # NOTE: the true zero-cost forward is `return self.embedding`; the
        # Pallas kernel is kept only because a kernelized forward is required.
        # If the caller can donate the parameter buffer, an even cheaper
        # variant is `input_output_aliases={0: 0}` (zero HBM traffic).
        return channel_vector_forward(self.embedding)


if __name__ == "__main__":
    key = jax.random.PRNGKey(0)

    # Small, unaligned embed_dim (the common ViT/BERT cls-token-ish case).
    embed_dim = 32
    module = ChannelVector(embed_dim, key)
    out = jax.block_until_ready(module())
    assert out.shape == (1, 1, embed_dim)
    assert out.dtype == jnp.float32
    assert jnp.array_equal(out, module.embedding)

    # Also exercise a lane/sublane-aligned embed_dim once (same code path,
    # single HBM->HBM DMA regardless of alignment).
    module_big = ChannelVector(1024, jax.random.PRNGKey(1))
    out_big = jax.block_until_ready(module_big())
    assert out_big.shape == (1, 1, 1024)
    assert jnp.array_equal(out_big, module_big.embedding)

    print("KERNEL_OK")
</pallas_src>

<mosaic_0001>
module attributes {stable_mosaic.version = 11 : i64} {
  func.func @_hbm_identity_kernel(%arg0: memref<1x1x32xf32, #tpu.memory_space<any>>, %arg1: memref<1x1x32xf32, #tpu.memory_space<any>>, %arg2: memref<!tpu.dma_semaphore, #tpu.memory_space<semaphore_mem>>) attributes {dimension_semantics = [], scalar_prefetch = 0 : i64, scratch_operands = 1 : i64, tpu.core_type = #tpu.core_type<tc>} {
    tpu.enqueue_dma source(%arg0 : memref<1x1x32xf32, #tpu.memory_space<any>>) target(%arg1 : memref<1x1x32xf32, #tpu.memory_space<any>>) target_semaphore(%arg2 : memref<!tpu.dma_semaphore, #tpu.memory_space<semaphore_mem>>)
    tpu.wait_dma2 semaphore(%arg2 : memref<!tpu.dma_semaphore, #tpu.memory_space<semaphore_mem>>) src(%arg0 : memref<1x1x32xf32, #tpu.memory_space<any>>) dst(%arg1 : memref<1x1x32xf32, #tpu.memory_space<any>>)
    return
  }
}

</mosaic_0001>

<bundles_post_ra>
// kernel: tpu_custom_call.1
= control target key start
LH: loop header
LB: loop body
LE: loop exit
PB: predicated region body
PF: predicated region fallthrough
CT: control target
= control target key end

     0   :  { %s35_s6 = smov [#allocation2]   ;;  %s36_s7 = smov [#allocation3]   ;;  %s54_s0 = inlined_call_operand.hbm [shape: f32[1,1,32], index: 0, kind: input, shape index: {}]   ;;  %s55_s1 = inlined_call_operand.hbm [shape: f32[1,1,32], index: 1, kind: output, shape index: {}]  }
   0x1   :  { %s37_s8 = smov 0  }
   0x2   :  { %18 = dma.general %s54_s0, 16, %s55_s1, %s35_s6, %s36_s7, [#allocation4], %s37_s8, 0  }
   0x3   :  { %33 = dma.done.wait [#allocation2], 16 }
   0x4   :  { %34 = vsyncadd [#allocation2], 4294967280 }
   0x5   :  { %23 = vsyncmov [#allocation2] }
   0x8   :  { %s24_s13 = vpop.sfrf %23 }
   0x9   :  { %p29_p0 = scmp.ne.s32.totalorder %s24_s13, 0 }
   0xb   :  { %28 = shalt.err (%p29_p0)  }

</bundles_post_ra>
